<compile_context>
chip_gen: v6e
topology: v6e:2x2x1
jax: 0.10.0
libtpu: 0.0.40
codegen_flags: <defaults>
</compile_context>

<pallas_src>
import math

import jax
import jax.numpy as jnp
from jax.experimental import pallas as pl
from jax.experimental.pallas import tpu as pltpu


# ----------------------------- kernels -----------------------------

def degree_kernel(adj_ref, dinv_ref, acc_ref):
    """Row-sum reduction over column tiles -> D^{-1/2} with torch.nan_to_num(...)->0 semantics."""
    k = pl.program_id(1)

    @pl.when(k == 0)
    def _():
        acc_ref[...] = jnp.zeros_like(acc_ref)

    acc_ref[...] += jnp.sum(adj_ref[...].astype(jnp.float32), axis=1, keepdims=True)

    @pl.when(k == pl.num_programs(1) - 1)
    def _():
        d = acc_ref[...]
        # matches nan_to_num(diag((1/d).sqrt()) @ adj @ diag((1/d).sqrt()), nan/posinf/neginf -> 0)
        dinv_ref[...] = jnp.where(d > 0.0, jax.lax.rsqrt(d), 0.0)


def propagate_reassoc_kernel(drow_ref, adj_ref, xw_ref, b_ref, o_ref, acc_ref):
    """out = drow * (A @ Xw) + b, where Xw = (dcol * x) @ W was precomputed (C < F path)."""
    k = pl.program_id(1)

    @pl.when(k == 0)
    def _():
        acc_ref[...] = jnp.zeros_like(acc_ref)

    a = adj_ref[...].astype(jnp.float32)     # adj streamed narrow from HBM, upcast in vregs
    acc_ref[...] += jnp.dot(a, xw_ref[...], preferred_element_type=jnp.float32)

    @pl.when(k == pl.num_programs(1) - 1)
    def _():
        o_ref[...] = (acc_ref[...] * drow_ref[...] + b_ref[...]).astype(o_ref.dtype)


def propagate_weight_kernel(drow_ref, adj_ref, xs_ref, w_ref, b_ref, o_ref, acc_ref):
    """out = (drow * (A @ xs)) @ W + b, where xs = dcol * x was precomputed (C >= F path)."""
    k = pl.program_id(1)

    @pl.when(k == 0)
    def _():
        acc_ref[...] = jnp.zeros_like(acc_ref)

    a = adj_ref[...].astype(jnp.float32)
    acc_ref[...] += jnp.dot(a, xs_ref[...], preferred_element_type=jnp.float32)

    @pl.when(k == pl.num_programs(1) - 1)
    def _():
        h = acc_ref[...] * drow_ref[...]
        o_ref[...] = (jnp.dot(h, w_ref[...], preferred_element_type=jnp.float32)
                      + b_ref[...]).astype(o_ref.dtype)


# ----------------------------- block picking -----------------------------

_SUBLANE_CANDS = (1024, 512, 256, 128, 64, 32, 16, 8)
_LANE_CANDS = (2048, 1024, 512, 256, 128)


def _pick_row_block(n):
    """Row (sublane) block: prefer >= 2 tiles so the parallel axis can feed both v7x TCs."""
    for c in _SUBLANE_CANDS:
        if 2 * c <= n and n % c == 0:
            return c
    for c in _SUBLANE_CANDS:
        if c <= n and n % c == 0:
            return c
    return n  # full extent


def _pick_lane_block(n):
    """Lane (last-dim) block: must be a multiple of 128 or the full array extent."""
    for c in _LANE_CANDS:
        if c <= n and n % c == 0:
            return c
    return n  # full extent


# ----------------------------- wrappers -----------------------------

def compute_deg_inv_rsqrt(adj_stream, *, block_rows=None, block_cols=None, compiler_params=None):
    """D^{-1/2} as an [N, 1] f32 column (reusable across stacked layers sharing one adj)."""
    n = adj_stream.shape[0]
    bm = block_rows or _pick_row_block(n)
    bk = block_cols or _pick_lane_block(n)
    assert n % bm == 0 and n % bk == 0
    return pl.pallas_call(
        degree_kernel,
        out_shape=jax.ShapeDtypeStruct((n, 1), jnp.float32),
        grid_spec=pltpu.PrefetchScalarGridSpec(
            num_scalar_prefetch=0,
            grid=(n // bm, n // bk),
            in_specs=[pl.BlockSpec((bm, bk), lambda i, k: (i, k))],
            out_specs=pl.BlockSpec((bm, 1), lambda i, k: (i, 0)),
            scratch_shapes=[pltpu.VMEM((bm, 1), jnp.float32)],
        ),
        compiler_params=compiler_params,
    )(adj_stream)


def graph_conv_layer(x, adj, w, b, x0=None, *, deg_inv=None,
                     adj_stream_dtype=jnp.bfloat16,
                     block_rows=None, block_cols=None):
    """Pallas forward of GraphConvLayer(use_weight=True, use_init=False). x0 is unused.

    w: Linear weight pre-transposed to [F_in, F_out];  b: bias [1, F_out].
    deg_inv: optional precomputed D^{-1/2} [N, 1] (hoist across stacked layers).
    """
    del x0  # use_init=False -> x0 ignored
    n, f = x.shape
    c = w.shape[1]
    bm = block_rows or _pick_row_block(n)
    bk = block_cols or _pick_lane_block(n)
    assert n % bm == 0 and n % bk == 0
    grid = (n // bm, n // bk)

    cp = pltpu.CompilerParams(
        dimension_semantics=("parallel", "arbitrary"),
        vmem_limit_bytes=48 * 1024 * 1024,   # within v7x's 64 MiB physical VMEM
    )

    # Narrow the bandwidth-bound adjacency stream (exact for 0/1 adjacency).
    adj_stream = adj.astype(adj_stream_dtype)

    # Pass 1: per-node degrees -> D^{-1/2} (global reduction over adj columns).
    if deg_inv is None:
        deg_inv = compute_deg_inv_rsqrt(adj_stream, block_rows=bm, block_cols=bk,
                                        compiler_params=cp)

    hp = jax.lax.Precision.HIGHEST
    # Column scaling hoisted out of the k-loop (done once, not once per row tile).
    xs = x.astype(jnp.float32) * deg_inv
    w32 = w.astype(jnp.float32)
    b32 = b.astype(jnp.float32)

    if c < f:
        # Reassociated order: fold W before propagation -> [bm, C] accumulator, one matmul/step.
        xw = jnp.dot(xs, w32, precision=hp)
        out = pl.pallas_call(
            propagate_reassoc_kernel,
            out_shape=jax.ShapeDtypeStruct((n, c), jnp.float32),
            grid_spec=pltpu.PrefetchScalarGridSpec(
                num_scalar_prefetch=0,
                grid=grid,
                in_specs=[
                    pl.BlockSpec((bm, 1), lambda i, k: (i, 0)),    # D^{-1/2} for output row tile
                    pl.BlockSpec((bm, bk), lambda i, k: (i, k)),   # adjacency tile (narrow dtype)
                    pl.BlockSpec((bk, c), lambda i, k: (k, 0)),    # Xw tile
                    pl.BlockSpec((1, c), lambda i, k: (0, 0)),     # bias
                ],
                out_specs=pl.BlockSpec((bm, c), lambda i, k: (i, 0)),
                scratch_shapes=[pltpu.VMEM((bm, c), jnp.float32)],
            ),
            compiler_params=cp,
        )(deg_inv, adj_stream, xw, b32)
    else:
        # Original order: propagate x first, apply W once per row tile at finalize.
        out = pl.pallas_call(
            propagate_weight_kernel,
            out_shape=jax.ShapeDtypeStruct((n, c), jnp.float32),
            grid_spec=pltpu.PrefetchScalarGridSpec(
                num_scalar_prefetch=0,
                grid=grid,
                in_specs=[
                    pl.BlockSpec((bm, 1), lambda i, k: (i, 0)),    # D^{-1/2} for output row tile
                    pl.BlockSpec((bm, bk), lambda i, k: (i, k)),   # adjacency tile (narrow dtype)
                    pl.BlockSpec((bk, f), lambda i, k: (k, 0)),    # pre-scaled x tile
                    pl.BlockSpec((f, c), lambda i, k: (0, 0)),     # W (pre-transposed [F_in, F_out])
                    pl.BlockSpec((1, c), lambda i, k: (0, 0)),     # bias
                ],
                out_specs=pl.BlockSpec((bm, c), lambda i, k: (i, 0)),
                scratch_shapes=[pltpu.VMEM((bm, f), jnp.float32)],
            ),
            compiler_params=cp,
        )(deg_inv, adj_stream, xs, w32, b32)
    return out


# ----------------------------- reference (plain JAX, for sanity) -----------------------------

def reference_forward(x, adj, w, b):
    hp = jax.lax.Precision.HIGHEST
    d = jnp.sum(adj, axis=1)
    dn = 1.0 / jnp.sqrt(d)
    adj_n = adj * dn[:, None] * dn[None, :]           # == diag(dn) @ adj @ diag(dn)
    adj_n = jnp.nan_to_num(adj_n, nan=0.0, posinf=0.0, neginf=0.0)
    h = jnp.dot(adj_n, x, precision=hp)
    return jnp.dot(h, w, precision=hp) + b            # use_weight=True


# ----------------------------- main -----------------------------

if __name__ == "__main__":
    N, IN_C, OUT_C = 256, 64, 32

    key = jax.random.PRNGKey(0)
    kx, kadj, kw, kb = jax.random.split(key, 4)

    x = jax.random.normal(kx, (N, IN_C), dtype=jnp.float32)
    # random symmetric 0/1 adjacency with self loops (dense)
    a = (jax.random.uniform(kadj, (N, N)) < 0.15).astype(jnp.float32)
    adj = jnp.maximum(jnp.maximum(a, a.T), jnp.eye(N, dtype=jnp.float32))
    x0 = x  # unused (use_init=False)

    bound = 1.0 / math.sqrt(IN_C)
    w = jax.random.uniform(kw, (IN_C, OUT_C), jnp.float32, -bound, bound)   # pre-transposed Linear weight
    b = jax.random.uniform(kb, (1, OUT_C), jnp.float32, -bound, bound)

    out = graph_conv_layer(x, adj, w, b, x0)
    out = jax.block_until_ready(out)

    ref = reference_forward(x, adj, w, b)
    assert out.shape == (N, OUT_C)
    assert bool(jnp.all(jnp.isfinite(out)))
    assert bool(jnp.allclose(out, ref, rtol=1e-2, atol=1e-2)), "mismatch vs plain-JAX reference"

    print("KERNEL_OK")
</pallas_src>

<mosaic_0001>
module attributes {stable_mosaic.version = 11 : i64} {
  func.func @degree_kernel(%arg0: i32, %arg1: i32, %arg2: memref<128x256xbf16, #tpu.memory_space<vmem>>, %arg3: memref<128x1xf32, #tpu.memory_space<vmem>>, %arg4: memref<128x1xf32, #tpu.memory_space<vmem>>) attributes {dimension_semantics = [#tpu.dimension_semantics<parallel>, #tpu.dimension_semantics<arbitrary>], iteration_bounds = array<i64: 2, 1>, scalar_prefetch = 0 : i64, scratch_operands = 1 : i64, tpu.core_type = #tpu.core_type<tc>, window_params = [{transform_indices = @transform_0, window_bounds = array<i64: 128, 256>}, {transform_indices = @transform_1, window_bounds = array<i64: 128, 1>}]} {
    %c0_i32 = arith.constant 0 : i32
    %0 = arith.cmpi eq, %arg1, %c0_i32 : i32
    %1 = arith.extui %0 : i1 to i32
    %c0_i32_0 = arith.constant 0 : i32
    %2 = arith.cmpi ne, %1, %c0_i32_0 : i32
    scf.if %2 {
      %cst_8 = arith.constant 0.000000e+00 : f32
      %13 = vector.broadcast %cst_8 : f32 to vector<128x1xf32>
      %c0_9 = arith.constant 0 : index
      %c0_10 = arith.constant 0 : index
      %14 = vector.load %arg4[%c0_9, %c0_10] : memref<128x1xf32, #tpu.memory_space<vmem>>, vector<128x1xf32>
      tpu.vector_store %arg4[%c0_9, %c0_10], %13 {strides = array<i32>} : memref<128x1xf32, #tpu.memory_space<vmem>>, vector<128x1xf32>,
    } else {
    }
    %c0 = arith.constant 0 : index
    %c0_1 = arith.constant 0 : index
    %3 = vector.load %arg4[%c0, %c0_1] : memref<128x1xf32, #tpu.memory_space<vmem>>, vector<128x1xf32>
    %c0_2 = arith.constant 0 : index
    %c0_3 = arith.constant 0 : index
    %4 = vector.load %arg2[%c0_2, %c0_3] : memref<128x256xbf16, #tpu.memory_space<vmem>>, vector<128x256xbf16>
    %5 = arith.extf %4 : vector<128x256xbf16> to vector<128x256xf32>
    %cst = arith.constant dense<0.000000e+00> : vector<128xf32>
    %6 = vector.multi_reduction <add>, %5, %cst [1] : vector<128x256xf32> to vector<128xf32>
    %7 = vector.shape_cast %6 : vector<128xf32> to vector<128x1xf32>
    %8 = arith.addf %3, %7 : vector<128x1xf32>
    %c0_4 = arith.constant 0 : index
    %c0_5 = arith.constant 0 : index
    %9 = vector.load %arg4[%c0_4, %c0_5] : memref<128x1xf32, #tpu.memory_space<vmem>>, vector<128x1xf32>
    tpu.vector_store %arg4[%c0_4, %c0_5], %8 {strides = array<i32>} : memref<128x1xf32, #tpu.memory_space<vmem>>, vector<128x1xf32>,
    %c0_i32_6 = arith.constant 0 : i32
    %10 = arith.cmpi eq, %arg1, %c0_i32_6 : i32
    %11 = arith.extui %10 : i1 to i32
    %c0_i32_7 = arith.constant 0 : i32
    %12 = arith.cmpi ne, %11, %c0_i32_7 : i32
    scf.if %12 {
      %c0_8 = arith.constant 0 : index
      %c0_9 = arith.constant 0 : index
      %13 = vector.load %arg4[%c0_8, %c0_9] : memref<128x1xf32, #tpu.memory_space<vmem>>, vector<128x1xf32>
      %cst_10 = arith.constant 0.000000e+00 : f32
      %14 = vector.broadcast %cst_10 : f32 to vector<128x1xf32>
      %15 = arith.cmpf ogt, %13, %14 : vector<128x1xf32>
      %16 = math.rsqrt %13 : vector<128x1xf32>
      %cst_11 = arith.constant 0.000000e+00 : f32
      %17 = vector.broadcast %cst_11 : f32 to vector<128x1xf32>
      %18 = arith.select %15, %16, %17 : vector<128x1xi1>, vector<128x1xf32>
      %c0_12 = arith.constant 0 : index
      %c0_13 = arith.constant 0 : index
      %19 = vector.load %arg3[%c0_12, %c0_13] : memref<128x1xf32, #tpu.memory_space<vmem>>, vector<128x1xf32>
      tpu.vector_store %arg3[%c0_12, %c0_13], %18 {strides = array<i32>} : memref<128x1xf32, #tpu.memory_space<vmem>>, vector<128x1xf32>,
    } else {
    }
    return
  }
  func.func @transform_0(%arg0: i32, %arg1: i32) -> (i32, i32) {
    %c0_i32 = arith.constant 0 : i32
    return %arg0, %arg1 : i32, i32
  }
  func.func @transform_1(%arg0: i32, %arg1: i32) -> (i32, i32) {
    %c0_i32 = arith.constant 0 : i32
    %c0_i32_0 = arith.constant 0 : i32
    return %arg0, %c0_i32 : i32, i32
  }
}

</mosaic_0001>

<bundles_post_ra>
// kernel: tpu_custom_call.1
= control target key start
LH: loop header
LB: loop body
LE: loop exit
PB: predicated region body
PF: predicated region fallthrough
CT: control target
= control target key end

     0   :  { %6 = vsyncpa [#allocation4], 0  ;;  %s880_s0 = inlined_call_operand.hbm [shape: bf16[256,256], index: 0, kind: input, shape index: {}]   ;;  %s881_s1 = inlined_call_operand.vmem [shape: f32[256,1], index: 1, kind: output, shape index: {}]  }
   0x1   :  { %8 = vsyncpa [#allocation4 + $0x1], 0  ;;  %s685_s6 = smov 0   ;;  %s687_s7 = smov 0  }
   0x2   :  { %s689_s8 = smov 0   ;;  %s691_s9 = smov 0  }
   0x3   :  { %s693_s10 = smov 0   ;;  %s695_s11 = smov 0  }
   0x4 LB: > { %s485_s12 = sadd.s32 4294967295, %s669_s11   ;;  %s26_s13 = sadd.s32 1, %s665_s10  ;;  %s669_s11 = sphi %s695_s11, %s14_s11   ;;  %s665_s10 = sphi %s693_s10, %s889_s10   ;;  %s661_s9 = sphi %s691_s9, %s888_s9   ;;  %s657_s8 = sphi %s689_s8, %s887_s8   ;;  %s653_s7 = sphi %s687_s7, %s886_s7   ;;  %s649_s6 = sphi %s685_s6, %s885_s6  }
   0x5   : > { %p28_p0 = scmp.ge.s32.totalorder %s26_s13, 2  ;;  %s35_s14 = sadd.s32 1, %s657_s8 }
   0x6   : > { %p42_p1 = scmp.ne.s32.totalorder %s657_s8, %s653_s7  ;;  %p43_p2 = scmp.eq.s32.totalorder %s669_s11, 0 }
   0x7   : > { %s891_s13 = smov (%p28_p0, %s26_s13), 0  ;;  %p48_p4 = scmp.ne.s32.totalorder %s653_s7, %s649_s6 }
   0x8   : > { %p721_p3 = por %p43_p2, %p42_p1  ;;  %s30_s16 = ssub.s32 %s665_s10, %s891_s13 }
   0x9   : > { %p49_p5 = scmp.eq.s32.totalorder %s485_s12, 0  ;;  %p33_p6 = scmp.eq.s32.totalorder %s30_s16, 0 }
   0xa   : > { %p507_p8 = scmp.lt.s32.totalorder %s669_s11, 2  ;;  %s98_s19 = sand.u32 1, %s657_s8  }
   0xb   : > { %p728_p7 = por %p49_p5, %p48_p4  ;;  %s500_s20 = sshll.u32 %s665_s10, 11 }
   0xc   : > { %s734_s18 = scalar_select %p33_p6, %s657_s8, %s35_s14  }
   0xd   : > { %s489_s21 = sshll.u32 %s98_s19, 7  ;;  %s111_s24 = scalar_lea.hbm %s880_s0, %s500_s20 }
   0xe   : > { %s102_s25 = scalar_lea.vmem [#allocation3], %s489_s21  ;;  %p743_p9 = pnand %p507_p8, %p721_p3 }
   0xf   : > { %s112_s26 = sshll.u32 %s102_s25, 4  ;;  %s99_s28 = scalar_lea.sflag [#allocation4], %s98_s19  ;;  %s113_s26 = int_to_ptr.vmem [resolvable:$true] %s112_s26 }
  0x10   : > { %p593_p10 = pneg %p743_p9  ;;  %s604_s29 = scalar_lea.vmem %s113_s26, 2048 }
  0x11   : > { %p605_p11 = scmp.ne.s32.totalorder %s113_s26, %s604_s29  ;;  %s671_s30 = smov [#allocation3]  }
  0x12   : > { %s609_s2 = sshll.u32 %s671_s30, 4  ;;  %s610_s2 = int_to_ptr.vmem [resolvable:$false] %s609_s2 }
  0x13   : > { %p607_p12 = pnand %p605_p11, %p593_p10  ;;  %s611_s3 = scalar_lea.vmem %s610_s2, 4096 }
  0x14   : > { %p612_p0 = scmp.lt.s32.totalorder %s113_s26, %s610_s2  ;;  %p613_p1 = scmp.lt.s32.totalorder %s611_s3, %s604_s29 }
  0x15   : > { %p608_p13 = pneg %p607_p12 }
  0x16   : > { %p614_p2 = por %p613_p1, %p612_p0 }
  0x18   : > { %p615_p3 = pnand %p614_p2, %p608_p13 }
  0x1a   : > { %618 = shalt.err (!%p615_p3)
}
  0x1b   : > { %s672_s4 = smov 128   ;;  %s673_s5 = smov 8  }
  0x1c   : > { %506 = dma.hbm_to_vmem [thread:$0]  (!%p743_p9), %s111_s24, 2048, %s113_s26, %s99_s28, %s672_s4, %s672_s4, %s673_s5  }
  0x1d   : > { %p493_p4 = scmp.ge.s32.totalorder %s669_s11, 1  ;;  %p120_p5 = scmp.lt.s32.totalorder %s669_s11, 3 }
  0x1f   : > { %p121_p6 = pnand %p493_p4, %p120_p5 }
  0x20   : > { %s126_s6 = sand.u32 (!%p121_p6), 1, %s653_s7  }
  0x21   : > { %124 = sbr.rel (%p121_p6) target bundleno = 237 (0xed), region = 24  ;;  %s494_s12 = sshll.u32 (!%p121_p6), %s126_s6, 7 }
  0x22   : > { %s127_s14 = scalar_lea.sflag (!%p121_p6), [#allocation4], %s126_s6  ;;  %s754_s15 = scalar_lea.vmem (!%p121_p6), [#allocation3], %s494_s12 }
  0x26   : > { %644 = dma.done.wait (%p728_p7), %s127_s14, 2048  }
  0x27   : > { %646 = vsyncadd (%p728_p7), %s127_s14, 4294965248  ;;  %vm161_vm0 = vcmask 7168   ;;  %v674_v0 = vmov 0.0   ;;  %v196_v1 = vld [vmem:[%s754_s15 + $0x10] sm:$0xff]  ;;  %v194_v2 = vld [vmem:[%s754_s15] sm:$0xff]  ;;  %s495_s16 = sshll.u32 %s661_s9, 4 }
  0x28   : > { %164 = vst.msk [vmem:[#allocation2 + $0x10] sm:$0xff] %vm161_vm0, %v674_v0  ;;  %162 = vst.msk [vmem:[#allocation2] sm:$0xff] %vm161_vm0, %v674_v0  ;;  %v197_v3 = vld [vmem:[%s754_s15 + $0x18] sm:$0xff]  ;;  %v214_v4 = vunpack.c.l.bf16 %v196_v1  ;;  %v215_v5 = vunpack.c.h.bf16 %v196_v1  ;;  %v210_v6 = vunpack.c.l.bf16 %v194_v2  ;;  %v211_v7 = vunpack.c.h.bf16 %v194_v2  ;;  %v195_v8 = vld [vmem:[%s754_s15 + $0x8] sm:$0xff]  ;;  %p152_p7 = scmp.lt.s32.totalorder %s495_s16, 31 }
  0x29   : > { %163 = vst.msk [vmem:[#allocation2 + $0x8] sm:$0xff] %vm161_vm0, %v674_v0  ;;  %165 = vst.msk [vmem:[#allocation2 + $0x18] sm:$0xff] %vm161_vm0, %v674_v0  ;;  %v199_v9 = vld [vmem:[%s754_s15 + $0x28] sm:$0xff]  ;;  %v216_v10 = vunpack.c.l.bf16 %v197_v3  ;;  %v217_v11 = vunpack.c.h.bf16 %v197_v3  ;;  %v212_v12 = vunpack.c.l.bf16 %v195_v8  ;;  %v213_v13 = vunpack.c.h.bf16 %v195_v8  ;;  %v198_v14 = vld [vmem:[%s754_s15 + $0x20] sm:$0xff] }
  0x2a   : > { %166 = vst.msk [vmem:[#allocation2 + $0x20] sm:$0xff] %vm161_vm0, %v674_v0  ;;  %167 = vst.msk [vmem:[#allocation2 + $0x28] sm:$0xff] %vm161_vm0, %v674_v0  ;;  %v248_v15 = vadd.f32 %v215_v5, %v214_v4  ;;  %v242_v16 = vadd.f32 %v211_v7, %v210_v6  ;;  %v220_v17 = vunpack.c.l.bf16 %v199_v9  ;;  %v221_v18 = vunpack.c.h.bf16 %v199_v9  ;;  %v201_v23 = vld [vmem:[%s754_s15 + $0x38] sm:$0xff]  ;;  %v200_v24 = vld [vmem:[%s754_s15 + $0x30] sm:$0xff]  ;;  %s893_s16 = smov (!%p152_p7, %s495_s16), 31 }
  0x2b   : > { %168 = vst.msk [vmem:[#allocation2 + $0x30] sm:$0xff] %vm161_vm0, %v674_v0  ;;  %169 = vst.msk [vmem:[#allocation2 + $0x38] sm:$0xff] %vm161_vm0, %v674_v0  ;;  %v251_v19 = vadd.f32 %v217_v11, %v216_v10  ;;  %v245_v20 = vadd.f32 %v213_v13, %v212_v12  ;;  %v218_v21 = vunpack.c.l.bf16 %v198_v14  ;;  %v219_v22 = vunpack.c.h.bf16 %v198_v14  ;;  %v203_v31 = vld [vmem:[%s754_s15 + $0x48] sm:$0xff]  ;;  %v202_v32 = vld [vmem:[%s754_s15 + $0x40] sm:$0xff]  ;;  %s496_s9 = sshll.u32 %s893_s16, 3 }
  0x2c   : > { %170 = vst.msk [vmem:[#allocation2 + $0x40] sm:$0xff] %vm161_vm0, %v674_v0  ;;  %171 = vst.msk [vmem:[#allocation2 + $0x48] sm:$0xff] %vm161_vm0, %v674_v0  ;;  %249 = vadd.xlane.f32.xlu1 %v248_v15  ;;  %243 = vadd.xlane.f32.xlu0 %v242_v16  ;;  %v257_v25 = vadd.f32 %v221_v18, %v220_v17  ;;  %v224_v26 = vunpack.c.l.bf16 %v201_v23  ;;  %v225_v28 = vunpack.c.h.bf16 %v201_v23  ;;  %v222_v29 = vunpack.c.l.bf16 %v200_v24  ;;  %v205_v39 = vld [vmem:[%s754_s15 + $0x58] sm:$0xff]  ;;  %v204_v40 = vld [vmem:[%s754_s15 + $0x50] sm:$0xff]  ;;  %s817_s20 = scalar_lea.vmem %s881_s1, %s496_s9 }
  0x2d   : > { %172 = vst.msk [vmem:[#allocation2 + $0x50] sm:$0xff] %vm161_vm0, %v674_v0  ;;  %173 = vst.msk [vmem:[#allocation2 + $0x58] sm:$0xff] %vm161_vm0, %v674_v0  ;;  %v254_v27 = vadd.f32 %v219_v22, %v218_v21  ;;  %v223_v30 = vunpack.c.h.bf16 %v200_v24  ;;  %v228_v33 = vunpack.c.l.bf16 %v203_v31  ;;  %v229_v34 = vunpack.c.h.bf16 %v203_v31  ;;  %v207_v47 = vld [vmem:[%s754_s15 + $0x68] sm:$0xff]  ;;  %v206_v48 = vld [vmem:[%s754_s15 + $0x60] sm:$0xff] }
  0x2e   : > { %174 = vst.msk [vmem:[#allocation2 + $0x60] sm:$0xff] %vm161_vm0, %v674_v0  ;;  %175 = vst.msk [vmem:[#allocation2 + $0x68] sm:$0xff] %vm161_vm0, %v674_v0  ;;  %v263_v35 = vadd.f32 %v225_v28, %v224_v26  ;;  %v226_v37 = vunpack.c.l.bf16 %v202_v32  ;;  %v227_v38 = vunpack.c.h.bf16 %v202_v32  ;;  %v232_v42 = vunpack.c.l.bf16 %v205_v39  ;;  %v209_v55 = vld [vmem:[%s754_s15 + $0x78] sm:$0xff]  ;;  %v208_v56 = vld [vmem:[%s754_s15 + $0x70] sm:$0xff] }
  0x2f   : > { %176 = vst.msk [vmem:[#allocation2 + $0x70] sm:$0xff] %vm161_vm0, %v674_v0  ;;  %177 = vst.msk [vmem:[#allocation2 + $0x78] sm:$0xff] %vm161_vm0, %v674_v0  ;;  %v260_v36 = vadd.f32 %v223_v30, %v222_v29  ;;  %v269_v41 = vadd.f32 %v229_v34, %v228_v33  ;;  %v233_v44 = vunpack.c.h.bf16 %v205_v39  ;;  %v230_v45 = vunpack.c.l.bf16 %v204_v40  ;;  %v180_v1 = vld [vmem:[#allocation2 + $0x10] sm:$0xff]  ;;  %v178_v2 = vld [vmem:[#allocation2] sm:$0xff] }
  0x30   : > { %252 = vadd.xlane.f32.xlu1 %v251_v19  ;;  %246 = vadd.xlane.f32.xlu0 %v245_v20  ;;  %v266_v43 = vadd.f32 %v227_v38, %v226_v37  ;;  %v231_v46 = vunpack.c.h.bf16 %v204_v40  ;;  %v236_v49 = vunpack.c.l.bf16 %v207_v47  ;;  %v237_v50 = vunpack.c.h.bf16 %v207_v47  ;;  %v181_v7 = vld [vmem:[#allocation2 + $0x18] sm:$0xff]  ;;  %v179_v8 = vld [vmem:[#allocation2 + $0x8] sm:$0xff] }
  0x31   : > { %v275_v51 = vadd.f32 %v233_v44, %v232_v42  ;;  %v234_v53 = vunpack.c.l.bf16 %v206_v48  ;;  %v235_v54 = vunpack.c.h.bf16 %v206_v48  ;;  %v240_v58 = vunpack.c.l.bf16 %v209_v55  ;;  %v183_v13 = vld [vmem:[#allocation2 + $0x28] sm:$0xff]  ;;  %v182_v14 = vld [vmem:[#allocation2 + $0x20] sm:$0xff] }
  0x32   : > { %v272_v52 = vadd.f32 %v231_v46, %v230_v45  ;;  %v281_v57 = vadd.f32 %v237_v50, %v236_v49  ;;  %v241_v60 = vunpack.c.h.bf16 %v209_v55  ;;  %v238_v61 = vunpack.c.l.bf16 %v208_v56  ;;  %v185_v19 = vld [vmem:[#allocation2 + $0x38] sm:$0xff]  ;;  %v184_v22 = vld [vmem:[#allocation2 + $0x30] sm:$0xff] }
  0x33   : > { %v278_v59 = vadd.f32 %v235_v54, %v234_v53  ;;  %v239_v62 = vunpack.c.h.bf16 %v208_v56  ;;  %v186_v30 = vld [vmem:[#allocation2 + $0x40] sm:$0xff] }
  0x34   : > { %258 = vadd.xlane.f32.xlu1 %v257_v25  ;;  %255 = vadd.xlane.f32.xlu0 %v254_v27  ;;  %v287_v63 = vadd.f32 %v241_v60, %v240_v58  ;;  %v187_v27 = vld [vmem:[#allocation2 + $0x48] sm:$0xff]  ;;  %v188_v38 = vld [vmem:[#allocation2 + $0x50] sm:$0xff] }
  0x35   : > { %v284_v0 = vadd.f32 %v239_v62, %v238_v61  ;;  %v190_v46 = vld [vmem:[#allocation2 + $0x60] sm:$0xff] }
  0x36   : > { %v193_v54 = vld [vmem:[#allocation2 + $0x78] sm:$0xff]  ;;  %v192_v58 = vld [vmem:[#allocation2 + $0x70] sm:$0xff] }
  0x38   : > { %264 = vadd.xlane.f32.xlu1 %v263_v35  ;;  %261 = vadd.xlane.f32.xlu0 %v260_v36  ;;  %v189_v35 = vld [vmem:[#allocation2 + $0x58] sm:$0xff] }
  0x3c   : > { %270 = vadd.xlane.f32.xlu1 %v269_v41  ;;  %267 = vadd.xlane.f32.xlu0 %v266_v43  ;;  %v191_v43 = vld [vmem:[#allocation2 + $0x68] sm:$0xff] }
  0x40   : > { %276 = vadd.xlane.f32.xlu1 %v275_v51  ;;  %273 = vadd.xlane.f32.xlu0 %v272_v52 }
  0x44   : > { %282 = vadd.xlane.f32.xlu1 %v281_v57  ;;  %279 = vadd.xlane.f32.xlu0 %v278_v59 }
  0x48   : > { %288 = vadd.xlane.f32.xlu1 %v287_v63  ;;  %285 = vadd.xlane.f32.xlu0 %v284_v0 }
  0xb5   : > { %v250_v3 = vpop.xlane.xlu1 %249  ;;  %v244_v4 = vpop.xlane.xlu0 %243 }
  0xb6   : > { %v292_v5 = vadd.f32 %v250_v3, %v180_v1  ;;  %v290_v6 = vadd.f32 %v244_v4, %v178_v2 }
  0xb8   : > { %309 = vst.msk [vmem:[#allocation2 + $0x10] sm:$0xff] %vm161_vm0, %v292_v5  ;;  %307 = vst.msk [vmem:[#allocation2] sm:$0xff] %vm161_vm0, %v290_v6 }
  0xb9   : > { %v253_v9 = vpop.xlane.xlu1 %252  ;;  %v247_v10 = vpop.xlane.xlu0 %246 }
  0xba   : > { %v293_v11 = vadd.f32 %v253_v9, %v181_v7  ;;  %v291_v12 = vadd.f32 %v247_v10, %v179_v8 }
  0xbc   : > { %310 = vst.msk [vmem:[#allocation2 + $0x18] sm:$0xff] %vm161_vm0, %v293_v11  ;;  %308 = vst.msk [vmem:[#allocation2 + $0x8] sm:$0xff] %vm161_vm0, %v291_v12 }
  0xbd   : > { %v259_v15 = vpop.xlane.xlu1 %258  ;;  %v256_v16 = vpop.xlane.xlu0 %255 }
  0xbe   : > { %v295_v17 = vadd.f32 %v259_v15, %v183_v13  ;;  %v294_v18 = vadd.f32 %v256_v16, %v182_v14 }
  0xbf   : > { %v328_v20 = vld [vmem:[#allocation2 + $0x10] sm:$0xff]  ;;  %v326_v21 = vld [vmem:[#allocation2] sm:$0xff] }
  0xc0   : > { %559 = vrsqrt.f32 %v328_v20  ;;  %312 = vst.msk [vmem:[#allocation2 + $0x28] sm:$0xff] %vm161_vm0, %v295_v17  ;;  %311 = vst.msk [vmem:[#allocation2 + $0x20] sm:$0xff] %vm161_vm0, %v294_v18  ;;  %vm344_vm1 = vcmp.gt.f32.partialorder %v328_v20, 0.0  ;;  %vm342_vm2 = vcmp.gt.f32.partialorder %v326_v21, 0.0 }
  0xc1   : > { %561 = vrsqrt.f32 %v326_v21  ;;  %v265_v23 = vpop.xlane.xlu1 %264  ;;  %v262_v24 = vpop.xlane.xlu0 %261 }
  0xc2   : > { %v297_v25 = vadd.f32 %v265_v23, %v185_v19  ;;  %v296_v26 = vadd.f32 %v262_v24, %v184_v22 }
  0xc3   : > { %v329_v28 = vld [vmem:[#allocation2 + $0x18] sm:$0xff]  ;;  %v799_v29 = vld [vmem:[#allocation2 + $0x8] sm:$0xff] }
  0xc4   : > { %563 = vrsqrt.f32 %v329_v28  ;;  %314 = vst.msk [vmem:[#allocation2 + $0x38] sm:$0xff] %vm161_vm0, %v297_v25  ;;  %313 = vst.msk [vmem:[#allocation2 + $0x30] sm:$0xff] %vm161_vm0, %v296_v26  ;;  %vm345_vm3 = vcmp.gt.f32.partialorder %v329_v28, 0.0  ;;  %vm343_vm4 = vcmp.gt.f32.partialorder %v799_v29, 0.0 }
  0xc5   : > { %565 = vrsqrt.f32 %v799_v29  ;;  %v271_v31 = vpop.xlane.xlu1 %270  ;;  %v268_v32 = vpop.xlane.xlu0 %267 }
  0xc6   : > { %v299_v33 = vadd.f32 %v271_v31, %v187_v27  ;;  %v298_v34 = vadd.f32 %v268_v32, %v186_v30 }
  0xc7   : > { %v804_v36 = vld [vmem:[#allocation2 + $0x28] sm:$0xff]  ;;  %v806_v37 = vld [vmem:[#allocation2 + $0x20] sm:$0xff] }
  0xc8   : > { %567 = vrsqrt.f32 %v804_v36  ;;  %316 = vst.msk [vmem:[#allocation2 + $0x48] sm:$0xff] %vm161_vm0, %v299_v33  ;;  %315 = vst.msk [vmem:[#allocation2 + $0x40] sm:$0xff] %vm161_vm0, %v298_v34  ;;  %vm347_vm5 = vcmp.gt.f32.partialorder %v804_v36, 0.0  ;;  %vm346_vm6 = vcmp.gt.f32.partialorder %v806_v37, 0.0 }
  0xc9   : > { %569 = vrsqrt.f32 %v806_v37  ;;  %v277_v39 = vpop.xlane.xlu1 %276  ;;  %v274_v40 = vpop.xlane.xlu0 %273 }
  0xca   : > { %v301_v41 = vadd.f32 %v277_v39, %v189_v35  ;;  %v300_v42 = vadd.f32 %v274_v40, %v188_v38 }
  0xcb   : > { %v333_v44 = vld [vmem:[#allocation2 + $0x38] sm:$0xff]  ;;  %v812_v45 = vld [vmem:[#allocation2 + $0x30] sm:$0xff] }
  0xcc   : > { %571 = vrsqrt.f32 %v333_v44  ;;  %318 = vst.msk [vmem:[#allocation2 + $0x58] sm:$0xff] %vm161_vm0, %v301_v41  ;;  %317 = vst.msk [vmem:[#allocation2 + $0x50] sm:$0xff] %vm161_vm0, %v300_v42  ;;  %vm349_vm7 = vcmp.gt.f32.partialorder %v333_v44, 0.0  ;;  %vm348_vm8 = vcmp.gt.f32.partialorder %v812_v45, 0.0 }
  0xcd   : > { %v560_v47 = vpop.eup %559  ;;  %573 = vrsqrt.f32 %v812_v45  ;;  %v283_v48 = vpop.xlane.xlu1 %282 }
  0xce   : > { %v280_v49 = vpop.xlane.xlu0 %279  ;;  %v562_v50 = vpop.eup %561  ;;  %v376_v51 = vsel %vm344_vm1, %v560_v47, 0.0  ;;  %v303_v52 = vadd.f32 %v283_v48, %v191_v43 }
  0xcf   : > { %v302_v53 = vadd.f32 %v280_v49, %v190_v46  ;;  %392 = vst.msk [vmem:[%s817_s20 + $0x10] sm:$0xff] %vm161_vm0, %v376_v51  ;;  %v374_v55 = vsel %vm342_vm2, %v562_v50, 0.0  ;;  %v335_v56 = vld [vmem:[#allocation2 + $0x48] sm:$0xff]  ;;  %v334_v57 = vld [vmem:[#allocation2 + $0x40] sm:$0xff] }
  0xd0   : > { %390 = vst.msk [vmem:[%s817_s20] sm:$0xff] %vm161_vm0, %v374_v55  ;;  %575 = vrsqrt.f32 %v335_v56  ;;  %320 = vst.msk [vmem:[#allocation2 + $0x68] sm:$0xff] %vm161_vm0, %v303_v52  ;;  %vm351_vm9 = vcmp.gt.f32.partialorder %v335_v56, 0.0  ;;  %vm350_vm10 = vcmp.gt.f32.partialorder %v334_v57, 0.0 }
  0xd1   : > { %319 = vst.msk [vmem:[#allocation2 + $0x60] sm:$0xff] %vm161_vm0, %v302_v53  ;;  %v564_v59 = vpop.eup %563  ;;  %577 = vrsqrt.f32 %v334_v57  ;;  %v289_v60 = vpop.xlane.xlu1 %288 }
  0xd2   : > { %v286_v61 = vpop.xlane.xlu0 %285  ;;  %v566_v62 = vpop.eup %565  ;;  %v377_v63 = vsel %vm345_vm3, %v564_v59, 0.0  ;;  %v305_v0 = vadd.f32 %v289_v60, %v193_v54 }
  0xd3   : > { %v304_v1 = vadd.f32 %v286_v61, %v192_v58  ;;  %393 = vst.msk [vmem:[%s817_s20 + $0x18] sm:$0xff] %vm161_vm0, %v377_v63  ;;  %v375_v2 = vsel %vm343_vm4, %v566_v62, 0.0  ;;  %v337_v3 = vld [vmem:[#allocation2 + $0x58] sm:$0xff]  ;;  %v336_v4 = vld [vmem:[#allocation2 + $0x50] sm:$0xff] }
  0xd4   : > { %391 = vst.msk [vmem:[%s817_s20 + $0x8] sm:$0xff] %vm161_vm0, %v375_v2  ;;  %579 = vrsqrt.f32 %v337_v3  ;;  %322 = vst.msk [vmem:[#allocation2 + $0x78] sm:$0xff] %vm161_vm0, %v305_v0  ;;  %vm353_vm11 = vcmp.gt.f32.partialorder %v337_v3, 0.0  ;;  %vm352_vm12 = vcmp.gt.f32.partialorder %v336_v4, 0.0 }
  0xd5   : > { %321 = vst.msk [vmem:[#allocation2 + $0x70] sm:$0xff] %vm161_vm0, %v304_v1  ;;  %v568_v5 = vpop.eup %567  ;;  %581 = vrsqrt.f32 %v336_v4 }
  0xd6   : > { %v570_v6 = vpop.eup %569  ;;  %v379_v7 = vsel %vm347_vm5, %v568_v5, 0.0 }
  0xd7   : > { %395 = vst.msk [vmem:[%s817_s20 + $0x28] sm:$0xff] %vm161_vm0, %v379_v7  ;;  %v378_v8 = vsel %vm346_vm6, %v570_v6, 0.0  ;;  %v339_v9 = vld [vmem:[#allocation2 + $0x68] sm:$0xff] }
  0xd8   : > { %v338_v10 = vld [vmem:[#allocation2 + $0x60] sm:$0xff]  ;;  %394 = vst.msk [vmem:[%s817_s20 + $0x20] sm:$0xff] %vm161_vm0, %v378_v8  ;;  %583 = vrsqrt.f32 %v339_v9  ;;  %vm355_vm13 = vcmp.gt.f32.partialorder %v339_v9, 0.0 }
  0xd9   : > { %v572_v11 = vpop.eup %571  ;;  %585 = vrsqrt.f32 %v338_v10  ;;  %vm354_vm14 = vcmp.gt.f32.partialorder %v338_v10, 0.0 }
  0xda   : > { %v574_v12 = vpop.eup %573  ;;  %v381_v13 = vsel %vm349_vm7, %v572_v11, 0.0 }
  0xdb   : > { %397 = vst.msk [vmem:[%s817_s20 + $0x38] sm:$0xff] %vm161_vm0, %v381_v13  ;;  %v380_v14 = vsel %vm348_vm8, %v574_v12, 0.0  ;;  %v341_v15 = vld [vmem:[#allocation2 + $0x78] sm:$0xff] }
  0xdc   : > { %v340_v16 = vld [vmem:[#allocation2 + $0x70] sm:$0xff]  ;;  %396 = vst.msk [vmem:[%s817_s20 + $0x30] sm:$0xff] %vm161_vm0, %v380_v14  ;;  %587 = vrsqrt.f32 %v341_v15  ;;  %vm357_vm15 = vcmp.gt.f32.partialorder %v341_v15, 0.0 }
  0xdd   : > { %v576_v17 = vpop.eup %575  ;;  %589 = vrsqrt.f32 %v340_v16  ;;  %vm356_vm1 = vcmp.gt.f32.partialorder %v340_v16, 0.0 }
  0xde   : > { %v578_v18 = vpop.eup %577  ;;  %v383_v19 = vsel %vm351_vm9, %v576_v17, 0.0 }
  0xdf   : > { %399 = vst.msk [vmem:[%s817_s20 + $0x48] sm:$0xff] %vm161_vm0, %v383_v19  ;;  %v382_v20 = vsel %vm350_vm10, %v578_v18, 0.0 }
  0xe0   : > { %398 = vst.msk [vmem:[%s817_s20 + $0x40] sm:$0xff] %vm161_vm0, %v382_v20 }
  0xe1   : > { %v580_v21 = vpop.eup %579 }
  0xe2   : > { %v582_v22 = vpop.eup %581  ;;  %v385_v23 = vsel %vm353_vm11, %v580_v21, 0.0 }
  0xe3   : > { %401 = vst.msk [vmem:[%s817_s20 + $0x58] sm:$0xff] %vm161_vm0, %v385_v23  ;;  %v384_v24 = vsel %vm352_vm12, %v582_v22, 0.0 }
  0xe4   : > { %400 = vst.msk [vmem:[%s817_s20 + $0x50] sm:$0xff] %vm161_vm0, %v384_v24 }
  0xe5   : > { %v584_v25 = vpop.eup %583 }
  0xe6   : > { %v586_v26 = vpop.eup %585  ;;  %v387_v27 = vsel %vm355_vm13, %v584_v25, 0.0 }
  0xe7   : > { %403 = vst.msk [vmem:[%s817_s20 + $0x68] sm:$0xff] %vm161_vm0, %v387_v27  ;;  %v386_v28 = vsel %vm354_vm14, %v586_v26, 0.0 }
  0xe8   : > { %402 = vst.msk [vmem:[%s817_s20 + $0x60] sm:$0xff] %vm161_vm0, %v386_v28 }
  0xe9   : > { %v588_v29 = vpop.eup %587 }
  0xea   : > { %v590_v30 = vpop.eup %589  ;;  %v389_v31 = vsel %vm357_vm15, %v588_v29, 0.0 }
  0xeb   : > { %405 = vst.msk [vmem:[%s817_s20 + $0x78] sm:$0xff] %vm161_vm0, %v389_v31  ;;  %v388_v32 = vsel %vm356_vm1, %v590_v30, 0.0 }
  0xec   : > { %404 = vst.msk [vmem:[%s817_s20 + $0x70] sm:$0xff] %vm161_vm0, %v388_v32 }
  0xed PF: > { %s14_s11 = sadd.s32 1, %s669_s11   ;;  %s885_s6 = smov %s653_s7 }
  0xee   : > { %p11_p8 = scmp.ge.s32.totalorder %s14_s11, 4   ;;  %s886_s7 = smov %s657_s8 }
  0xef   : > { %s887_s8 = smov %s734_s18  ;;  %s888_s9 = smov %s665_s10 }
  0xf0   : > { %s889_s10 = smov %s891_s13  ;;  %13 = sbr.rel (!%p11_p8) target bundleno = 4 (0x4), region = 72 }
  0xf5   :  { %428 = vsyncpa [#allocation4], 1 }
  0xf6   :  { %430 = vsyncpa [#allocation4 + $0x1], 1 }

</bundles_post_ra>
